<compile_context>
chip_gen: v7x
topology: tpu7x:2x2x1
jax: 0.10.0
libtpu: 0.0.40
codegen_flags: <defaults>
</compile_context>

<pallas_src>
import functools

import jax
import jax.numpy as jnp
from jax.experimental import pallas as pl
from jax.experimental.pallas import tpu as pltpu

LEAKY_SLOPE = 0.01  # nn.LeakyReLU default


def _lrelu(x):
    # LeakyReLU(x) == max(x, a*x) for 0 < a < 1  (mul + max, no cmp/select).
    return jnp.maximum(x, LEAKY_SLOPE * x)


def grad_net_kernel(x1_ref, x2_ref, w0t_ref, w0b_ref, b0_ref, w1_ref, b1_ref,
                    wc_ref, bc_ref, wo_ref, bo_ref, out_ref):
    f32 = jnp.float32
    cdt = w0t_ref.dtype  # matmul operand dtype (f32 or bf16); accumulation is f32

    # Layer 0, both towers. W0_top/W0_bot are the top/bottom D rows of the
    # block-diagonal layer-0 weight, so the sum of the two dots equals
    # cat([x1, x2]) @ blockdiag(w1a^T, w2a^T) with no concat op:  (TB, 2*H0)
    h = jnp.dot(x1_ref[...].astype(cdt), w0t_ref[...], preferred_element_type=f32)
    h = h + jnp.dot(x2_ref[...].astype(cdt), w0b_ref[...], preferred_element_type=f32)
    h = _lrelu(h + b0_ref[...])
    # Layer 1, both towers fused via block-diagonal W1: (TB,2H0)@(2H0,2H1)
    h = _lrelu(jnp.dot(h.astype(cdt), w1_ref[...],
                       preferred_element_type=f32) + b1_ref[...])
    # Merge layer: the fused h IS torch.cat([X1, X2], -1): (TB,2H1)@(2H1,H1)
    h = _lrelu(jnp.dot(h.astype(cdt), wc_ref[...],
                       preferred_element_type=f32) + bc_ref[...])
    # Output head (loss_type='mse' -> no sigmoid): VPU mul + lane reduction
    # (exact f32) instead of an MXU pass with a single useful result lane.
    y = jnp.sum(h * wo_ref[...], axis=-1, keepdims=True) + bo_ref[...]
    out_ref[...] = y.astype(out_ref.dtype)


def init_params(key, data_shape, hidden_shapes):
    """Deterministic parameter init mimicking GradNet.__init__ (torch Linear)."""
    def linear(k, fan_in, fan_out):
        kw, kb = jax.random.split(k)
        bound = 1.0 / jnp.sqrt(fan_in)
        w = jax.random.uniform(kw, (fan_out, fan_in), jnp.float32, -bound, bound)
        b = jax.random.uniform(kb, (fan_out,), jnp.float32, -bound, bound)
        return w, b

    keys = jax.random.split(key, 8)
    h0, h1 = hidden_shapes
    return {
        "l1_0": linear(keys[0], data_shape, h0),
        "l2_0": linear(keys[1], data_shape, h0),
        "l1_1": linear(keys[2], h0, h1),
        "l2_1": linear(keys[3], h0, h1),
        "l1_cat": linear(keys[4], 2 * h1, h1),   # layers_1[-2]
        "l1_out": linear(keys[5], h1, 1),        # layers_1[-1]
    }


def prepare_params(params, compute_dtype=jnp.float32):
    """One-time packing (call once, outside the forward).

    torch (out,in) weights -> (in,out); towers fused into block-diagonal
    weights; layer-0 weight pre-split into top/bottom row-slabs so x1/x2 can
    be fed to the kernel separately (no concat).  Biases stay f32 rows for the
    VPU epilogue.  Pass compute_dtype=jnp.bfloat16 for full-rate MXU and half
    the input DMA bytes (f32 accumulation is kept inside the kernel).
    """
    def t(w):
        return jnp.asarray(w, jnp.float32).T

    def row(b):
        return jnp.asarray(b, jnp.float32).reshape(1, -1)

    w1a, b1a = params["l1_0"]
    w2a, b2a = params["l2_0"]
    w1b, b1b = params["l1_1"]
    w2b, b2b = params["l2_1"]
    wc, bc = params["l1_cat"]
    wo, bo = params["l1_out"]

    d = w1a.shape[1]
    h0 = w1a.shape[0]
    h1 = w1b.shape[0]

    zero0 = jnp.zeros((d, h0), jnp.float32)
    w0_top = jnp.concatenate([t(w1a), zero0], axis=-1)   # (D, 2H0) = [w1a^T | 0]
    w0_bot = jnp.concatenate([zero0, t(w2a)], axis=-1)   # (D, 2H0) = [0 | w2a^T]

    zero1 = jnp.zeros((h0, h1), jnp.float32)
    w1_bd = jnp.block([[t(w1b), zero1], [zero1, t(w2b)]])  # (2H0, 2H1)

    return {
        "W0_top": w0_top.astype(compute_dtype),
        "W0_bot": w0_bot.astype(compute_dtype),
        "b0": jnp.concatenate([row(b1a), row(b2a)], axis=-1),   # (1, 2H0) f32
        "W1": w1_bd.astype(compute_dtype),
        "b1": jnp.concatenate([row(b1b), row(b2b)], axis=-1),   # (1, 2H1) f32
        "Wc": t(wc).astype(compute_dtype),                      # (2H1, H1)
        "bc": row(bc),                                          # (1, H1)  f32
        "wo_row": row(wo),                                      # (1, H1)  f32 (VPU head)
        "bo": jnp.asarray(bo, jnp.float32).reshape(1, 1),       # (1, 1)   f32
    }


def _pick_batch_tile(batch, block_b):
    """Static batch-tile choice: as large as possible (amortize per-step
    overhead), a multiple of 8 unless it equals the full batch, and >=2 grid
    steps when the batch allows it so the v7x megacore can split the work."""
    tb = min(batch, max(8, (block_b // 8) * 8))
    if tb == batch:
        if batch >= 16 and (batch // 2) % 8 == 0:
            tb = batch // 2        # two 8-row-aligned steps -> both v7x cores busy
        return tb
    return tb


@functools.partial(jax.jit, static_argnames=("block_b",))
def grad_net_forward(x1, x2, prepared, block_b=2048):
    assert x1.ndim == 2 and x1.shape == x2.shape
    B, D = x1.shape

    W0_top, W0_bot, b0 = prepared["W0_top"], prepared["W0_bot"], prepared["b0"]
    W1, b1 = prepared["W1"], prepared["b1"]
    Wc, bc = prepared["Wc"], prepared["bc"]
    wo_row, bo = prepared["wo_row"], prepared["bo"]

    cdt = W0_top.dtype
    if x1.dtype != cdt:
        # Ideally x1/x2 arrive already in the compute dtype (e.g. bf16) from
        # upstream; this cast is the fallback and costs one extra pass.
        x1 = x1.astype(cdt)
        x2 = x2.astype(cdt)

    TB = _pick_batch_tile(B, block_b)
    grid_b = pl.cdiv(B, TB)

    def resident(a):
        # Whole-array block with an invariant index_map: DMA'd once, stays
        # VMEM-resident across the batch grid (Pallas skips refetches when the
        # block index does not change; double-buffer cost is negligible here).
        return pl.BlockSpec(a.shape, lambda i: (0, 0))

    # No jnp.pad for ragged B: the net is row-independent; the edge block is
    # masked on the output store and OOB rows of the partial input tiles only
    # feed rows that are never written back.
    out = pl.pallas_call(
        grad_net_kernel,
        out_shape=jax.ShapeDtypeStruct((B, 1), jnp.float32),
        grid=(grid_b,),
        in_specs=[
            pl.BlockSpec((TB, D), lambda i: (i, 0)),   # x1 tile, auto-pipelined
            pl.BlockSpec((TB, D), lambda i: (i, 0)),   # x2 tile, auto-pipelined
            resident(W0_top), resident(W0_bot), resident(b0),
            resident(W1), resident(b1),
            resident(Wc), resident(bc),
            resident(wo_row), resident(bo),
        ],
        out_specs=pl.BlockSpec((TB, 1), lambda i: (i, 0)),
        compiler_params=pltpu.CompilerParams(
            dimension_semantics=("parallel",)),        # megacore split on v7x
    )(x1, x2, W0_top, W0_bot, b0, W1, b1, Wc, bc, wo_row, bo)
    return out


def grad_net_reference(x1, x2, params):
    """Pure-JAX reference matching the PyTorch forward exactly."""
    def lin(x, wb):
        w, b = wb
        return x @ w.T + b

    x1 = _lrelu(lin(x1, params["l1_0"]))
    x2 = _lrelu(lin(x2, params["l2_0"]))
    x1 = _lrelu(lin(x1, params["l1_1"]))
    x2 = _lrelu(lin(x2, params["l2_1"]))
    cat = jnp.concatenate([x1, x2], axis=-1)
    h = _lrelu(lin(cat, params["l1_cat"]))
    return lin(h, params["l1_out"])


if __name__ == "__main__":
    # Module config: data_shape=16, hidden_shapes=[32, 32], loss_type='mse'
    B, D_IN = 40, 16
    HIDDEN = (32, 32)

    key = jax.random.PRNGKey(0)
    k_p, k_x1, k_x2 = jax.random.split(key, 3)
    params = init_params(k_p, D_IN, HIDDEN)
    x1 = jax.random.normal(k_x1, (B, D_IN), jnp.float32)
    x2 = jax.random.normal(k_x2, (B, D_IN), jnp.float32)

    ref = grad_net_reference(x1, x2, params)

    # f32 path.  block_b=16 -> 3 grid steps including a ragged tail block, so
    # the no-pad masked-edge path is exercised even at this tiny demo size.
    prepared_f32 = prepare_params(params, compute_dtype=jnp.float32)
    out_f32 = grad_net_forward(x1, x2, prepared_f32, block_b=16)
    jax.block_until_ready(out_f32)
    assert out_f32.shape == (B, 1), out_f32.shape
    assert jnp.allclose(out_f32, ref, atol=1e-3, rtol=1e-3), "f32 mismatch vs reference"

    # bf16-operand path (f32 accumulation): halves input DMA bytes on
    # v5e/v6e/v7x; checked against the f32 reference with loose tolerance.
    prepared_bf16 = prepare_params(params, compute_dtype=jnp.bfloat16)
    out_bf16 = grad_net_forward(x1, x2, prepared_bf16, block_b=16)
    jax.block_until_ready(out_bf16)
    assert out_bf16.shape == (B, 1), out_bf16.shape
    assert jnp.allclose(out_bf16, ref, atol=5e-2, rtol=5e-2), "bf16 mismatch vs reference"

    print("KERNEL_OK")
</pallas_src>

<mosaic_0001>
module attributes {stable_mosaic.version = 11 : i64} {
  func.func @grad_net_kernel(%arg0: i32, %arg1: memref<16x16xf32, #tpu.memory_space<vmem>>, %arg2: memref<16x16xf32, #tpu.memory_space<vmem>>, %arg3: memref<16x64xf32, #tpu.memory_space<vmem>>, %arg4: memref<16x64xf32, #tpu.memory_space<vmem>>, %arg5: memref<1x64xf32, #tpu.memory_space<vmem>>, %arg6: memref<64x64xf32, #tpu.memory_space<vmem>>, %arg7: memref<1x64xf32, #tpu.memory_space<vmem>>, %arg8: memref<64x32xf32, #tpu.memory_space<vmem>>, %arg9: memref<1x32xf32, #tpu.memory_space<vmem>>, %arg10: memref<1x32xf32, #tpu.memory_space<vmem>>, %arg11: memref<1x1xf32, #tpu.memory_space<vmem>>, %arg12: memref<16x1xf32, #tpu.memory_space<vmem>>) attributes {dimension_semantics = [#tpu.dimension_semantics<parallel>], iteration_bounds = array<i64: 3>, scalar_prefetch = 0 : i64, scratch_operands = 0 : i64, tpu.core_type = #tpu.core_type<tc>, window_params = [{transform_indices = @transform_0, window_bounds = array<i64: 16, 16>}, {transform_indices = @transform_1, window_bounds = array<i64: 16, 16>}, {pipeline_mode = #tpu.pipeline_mode<synchronous>, transform_indices = @transform_2, window_bounds = array<i64: 16, 64>}, {pipeline_mode = #tpu.pipeline_mode<synchronous>, transform_indices = @transform_3, window_bounds = array<i64: 16, 64>}, {pipeline_mode = #tpu.pipeline_mode<synchronous>, transform_indices = @transform_4, window_bounds = array<i64: 1, 64>}, {pipeline_mode = #tpu.pipeline_mode<synchronous>, transform_indices = @transform_5, window_bounds = array<i64: 64, 64>}, {pipeline_mode = #tpu.pipeline_mode<synchronous>, transform_indices = @transform_6, window_bounds = array<i64: 1, 64>}, {pipeline_mode = #tpu.pipeline_mode<synchronous>, transform_indices = @transform_7, window_bounds = array<i64: 64, 32>}, {pipeline_mode = #tpu.pipeline_mode<synchronous>, transform_indices = @transform_8, window_bounds = array<i64: 1, 32>}, {pipeline_mode = #tpu.pipeline_mode<synchronous>, transform_indices = @transform_9, window_bounds = array<i64: 1, 32>}, {pipeline_mode = #tpu.pipeline_mode<synchronous>, transform_indices = @transform_10, window_bounds = array<i64: 1, 1>}, {transform_indices = @transform_11, window_bounds = array<i64: 16, 1>}]} {
    %c0 = arith.constant 0 : index
    %c0_0 = arith.constant 0 : index
    %0 = vector.load %arg1[%c0, %c0_0] : memref<16x16xf32, #tpu.memory_space<vmem>>, vector<16x16xf32>
    %c0_1 = arith.constant 0 : index
    %c0_2 = arith.constant 0 : index
    %1 = vector.load %arg3[%c0_1, %c0_2] : memref<16x64xf32, #tpu.memory_space<vmem>>, vector<16x64xf32>
    %cst = arith.constant dense<0.000000e+00> : vector<16x64xf32>
    %2 = tpu.matmul %0, %1, %cst {dimension_numbers = #tpu.dot_dimension_numbers<[1], [0], [0], [1], [0, 0, 1, 1], [], []>} : vector<16x16xf32>, vector<16x64xf32>, vector<16x64xf32> -> vector<16x64xf32>
    %c0_3 = arith.constant 0 : index
    %c0_4 = arith.constant 0 : index
    %3 = vector.load %arg2[%c0_3, %c0_4] : memref<16x16xf32, #tpu.memory_space<vmem>>, vector<16x16xf32>
    %c0_5 = arith.constant 0 : index
    %c0_6 = arith.constant 0 : index
    %4 = vector.load %arg4[%c0_5, %c0_6] : memref<16x64xf32, #tpu.memory_space<vmem>>, vector<16x64xf32>
    %cst_7 = arith.constant dense<0.000000e+00> : vector<16x64xf32>
    %5 = tpu.matmul %3, %4, %cst_7 {dimension_numbers = #tpu.dot_dimension_numbers<[1], [0], [0], [1], [0, 0, 1, 1], [], []>} : vector<16x16xf32>, vector<16x64xf32>, vector<16x64xf32> -> vector<16x64xf32>
    %6 = arith.addf %2, %5 : vector<16x64xf32>
    %c0_8 = arith.constant 0 : index
    %c0_9 = arith.constant 0 : index
    %7 = vector.load %arg5[%c0_8, %c0_9] : memref<1x64xf32, #tpu.memory_space<vmem>>, vector<1x64xf32>
    %8 = vector.broadcast %7 : vector<1x64xf32> to vector<16x64xf32>
    %9 = arith.addf %6, %8 : vector<16x64xf32>
    %cst_10 = arith.constant 0.00999999977 : f32
    %10 = vector.broadcast %cst_10 : f32 to vector<16x64xf32>
    %11 = arith.mulf %10, %9 : vector<16x64xf32>
    %12 = arith.maximumf %9, %11 : vector<16x64xf32>
    %c0_11 = arith.constant 0 : index
    %c0_12 = arith.constant 0 : index
    %13 = vector.load %arg6[%c0_11, %c0_12] : memref<64x64xf32, #tpu.memory_space<vmem>>, vector<64x64xf32>
    %cst_13 = arith.constant dense<0.000000e+00> : vector<16x64xf32>
    %14 = tpu.matmul %12, %13, %cst_13 {dimension_numbers = #tpu.dot_dimension_numbers<[1], [0], [0], [1], [0, 0, 1, 1], [], []>} : vector<16x64xf32>, vector<64x64xf32>, vector<16x64xf32> -> vector<16x64xf32>
    %c0_14 = arith.constant 0 : index
    %c0_15 = arith.constant 0 : index
    %15 = vector.load %arg7[%c0_14, %c0_15] : memref<1x64xf32, #tpu.memory_space<vmem>>, vector<1x64xf32>
    %16 = vector.broadcast %15 : vector<1x64xf32> to vector<16x64xf32>
    %17 = arith.addf %14, %16 : vector<16x64xf32>
    %cst_16 = arith.constant 0.00999999977 : f32
    %18 = vector.broadcast %cst_16 : f32 to vector<16x64xf32>
    %19 = arith.mulf %18, %17 : vector<16x64xf32>
    %20 = arith.maximumf %17, %19 : vector<16x64xf32>
    %c0_17 = arith.constant 0 : index
    %c0_18 = arith.constant 0 : index
    %21 = vector.load %arg8[%c0_17, %c0_18] : memref<64x32xf32, #tpu.memory_space<vmem>>, vector<64x32xf32>
    %cst_19 = arith.constant dense<0.000000e+00> : vector<16x32xf32>
    %22 = tpu.matmul %20, %21, %cst_19 {dimension_numbers = #tpu.dot_dimension_numbers<[1], [0], [0], [1], [0, 0, 1, 1], [], []>} : vector<16x64xf32>, vector<64x32xf32>, vector<16x32xf32> -> vector<16x32xf32>
    %c0_20 = arith.constant 0 : index
    %c0_21 = arith.constant 0 : index
    %23 = vector.load %arg9[%c0_20, %c0_21] : memref<1x32xf32, #tpu.memory_space<vmem>>, vector<1x32xf32>
    %24 = vector.broadcast %23 : vector<1x32xf32> to vector<16x32xf32>
    %25 = arith.addf %22, %24 : vector<16x32xf32>
    %cst_22 = arith.constant 0.00999999977 : f32
    %26 = vector.broadcast %cst_22 : f32 to vector<16x32xf32>
    %27 = arith.mulf %26, %25 : vector<16x32xf32>
    %28 = arith.maximumf %25, %27 : vector<16x32xf32>
    %c0_23 = arith.constant 0 : index
    %c0_24 = arith.constant 0 : index
    %29 = vector.load %arg10[%c0_23, %c0_24] : memref<1x32xf32, #tpu.memory_space<vmem>>, vector<1x32xf32>
    %30 = vector.broadcast %29 : vector<1x32xf32> to vector<16x32xf32>
    %31 = arith.mulf %28, %30 : vector<16x32xf32>
    %cst_25 = arith.constant dense<0.000000e+00> : vector<16xf32>
    %32 = vector.multi_reduction <add>, %31, %cst_25 [1] : vector<16x32xf32> to vector<16xf32>
    %33 = vector.shape_cast %32 : vector<16xf32> to vector<16x1xf32>
    %c0_26 = arith.constant 0 : index
    %c0_27 = arith.constant 0 : index
    %34 = vector.load %arg11[%c0_26, %c0_27] : memref<1x1xf32, #tpu.memory_space<vmem>>, vector<1x1xf32>
    %35 = vector.broadcast %34 : vector<1x1xf32> to vector<16x1xf32>
    %36 = arith.addf %33, %35 : vector<16x1xf32>
    %c0_28 = arith.constant 0 : index
    %c0_29 = arith.constant 0 : index
    %37 = vector.load %arg12[%c0_28, %c0_29] : memref<16x1xf32, #tpu.memory_space<vmem>>, vector<16x1xf32>
    tpu.vector_store %arg12[%c0_28, %c0_29], %36 {strides = array<i32>} : memref<16x1xf32, #tpu.memory_space<vmem>>, vector<16x1xf32>,
    return
  }
  func.func @transform_0(%arg0: i32) -> (i32, i32) {
    %c0_i32 = arith.constant 0 : i32
    %c0_i32_0 = arith.constant 0 : i32
    return %arg0, %c0_i32 : i32, i32
  }
  func.func @transform_1(%arg0: i32) -> (i32, i32) {
    %c0_i32 = arith.constant 0 : i32
    %c0_i32_0 = arith.constant 0 : i32
    return %arg0, %c0_i32 : i32, i32
  }
  func.func @transform_2(%arg0: i32) -> (i32, i32) {
    %c0_i32 = arith.constant 0 : i32
    %c0_i32_0 = arith.constant 0 : i32
    %c0_i32_1 = arith.constant 0 : i32
    return %c0_i32, %c0_i32_0 : i32, i32
  }
  func.func @transform_3(%arg0: i32) -> (i32, i32) {
    %c0_i32 = arith.constant 0 : i32
    %c0_i32_0 = arith.constant 0 : i32
    %c0_i32_1 = arith.constant 0 : i32
    return %c0_i32, %c0_i32_0 : i32, i32
  }
  func.func @transform_4(%arg0: i32) -> (i32, i32) {
    %c0_i32 = arith.constant 0 : i32
    %c0_i32_0 = arith.constant 0 : i32
    %c0_i32_1 = arith.constant 0 : i32
    return %c0_i32, %c0_i32_0 : i32, i32
  }
  func.func @transform_5(%arg0: i32) -> (i32, i32) {
    %c0_i32 = arith.constant 0 : i32
    %c0_i32_0 = arith.constant 0 : i32
    %c0_i32_1 = arith.constant 0 : i32
    return %c0_i32, %c0_i32_0 : i32, i32
  }
  func.func @transform_6(%arg0: i32) -> (i32, i32) {
    %c0_i32 = arith.constant 0 : i32
    %c0_i32_0 = arith.constant 0 : i32
    %c0_i32_1 = arith.constant 0 : i32
    return %c0_i32, %c0_i32_0 : i32, i32
  }
  func.func @transform_7(%arg0: i32) -> (i32, i32) {
    %c0_i32 = arith.constant 0 : i32
    %c0_i32_0 = arith.constant 0 : i32
    %c0_i32_1 = arith.constant 0 : i32
    return %c0_i32, %c0_i32_0 : i32, i32
  }
  func.func @transform_8(%arg0: i32) -> (i32, i32) {
    %c0_i32 = arith.constant 0 : i32
    %c0_i32_0 = arith.constant 0 : i32
    %c0_i32_1 = arith.constant 0 : i32
    return %c0_i32, %c0_i32_0 : i32, i32
  }
  func.func @transform_9(%arg0: i32) -> (i32, i32) {
    %c0_i32 = arith.constant 0 : i32
    %c0_i32_0 = arith.constant 0 : i32
    %c0_i32_1 = arith.constant 0 : i32
    return %c0_i32, %c0_i32_0 : i32, i32
  }
  func.func @transform_10(%arg0: i32) -> (i32, i32) {
    %c0_i32 = arith.constant 0 : i32
    %c0_i32_0 = arith.constant 0 : i32
    %c0_i32_1 = arith.constant 0 : i32
    return %c0_i32, %c0_i32_0 : i32, i32
  }
  func.func @transform_11(%arg0: i32) -> (i32, i32) {
    %c0_i32 = arith.constant 0 : i32
    %c0_i32_0 = arith.constant 0 : i32
    return %arg0, %c0_i32 : i32, i32
  }
}

</mosaic_0001>

<bundles_post_ra>
// kernel: grad_net_forward.1
= control target key start
LH: loop header
LB: loop body
LE: loop exit
PB: predicated region body
PF: predicated region fallthrough
CT: control target
= control target key end

     0   :  { %s1661_s0 = inlined_call_operand.vmem [shape: f32[40,16], index: 0, kind: input, shape index: {}]   ;;  %s1662_s1 = inlined_call_operand.vmem [shape: f32[40,16], index: 1, kind: input, shape index: {}]   ;;  %s1663_s2 = inlined_call_operand.vmem [shape: f32[16,64], index: 2, kind: input, shape index: {}]   ;;  %s1664_s3 = inlined_call_operand.vmem [shape: f32[16,64], index: 3, kind: input, shape index: {}]   ;;  %s1665_s4 = inlined_call_operand.vmem [shape: f32[1,64], index: 4, kind: input, shape index: {}]   ;;  %s1666_s5 = inlined_call_operand.vmem [shape: f32[64,64], index: 5, kind: input, shape index: {}]   ;;  %s1667_s6 = inlined_call_operand.vmem [shape: f32[1,64], index: 6, kind: input, shape index: {}]   ;;  %s1668_s7 = inlined_call_operand.vmem [shape: f32[64,32], index: 7, kind: input, shape index: {}]   ;;  %s1669_s8 = inlined_call_operand.vmem [shape: f32[1,32], index: 8, kind: input, shape index: {}]   ;;  %s1670_s9 = inlined_call_operand.vmem [shape: f32[1,32], index: 9, kind: input, shape index: {}]   ;;  %s1671_s10 = inlined_call_operand.<no memory space> [shape: f32[1,1], index: 10, kind: input, shape index: {}]   ;;  %s1672_s11 = inlined_call_operand.vmem [shape: f32[40,1], index: 11, kind: output, shape index: {}]  }
   0x1   :  { %v16_v0 = vstv %s1671_s10 }
   0x2   :  { %17 = vst [vmem:[#allocation2] sm:$0x1] %v16_v0 }
   0x3   :  { %s1499_s19 = smov 0   ;;  %s1501_s20 = smov 0  }
   0x4   :  { %s1503_s21 = smov 0  }
   0x5 LB: > { %s1512_s10 = sadd.s32 4294967295, %s1402_s21   ;;  %s1514_s22 = sadd.s32 1, %s1402_s21   ;;  %s1402_s21 = sphi %s1503_s21, %s1676_s21   ;;  %s1398_s20 = sphi %s1501_s20, %s1675_s20   ;;  %s1394_s19 = sphi %s1499_s19, %s1674_s19  }
   0x6   : > { %s268_s23 = ssub.s32 %s1402_s21, %s1514_s22  ;;  %s271_s24 = sadd.s32 1, %s1398_s20 }
   0x7   : > { %p269_p0 = scmp.eq.s32.totalorder %s268_s23, 0  ;;  %p281_p1 = scmp.ne.s32.totalorder %s1398_s20, %s1394_s19 }
   0x8   : > { %p282_p2 = scmp.eq.s32.totalorder %s1512_s10, 2  ;;  %p1099_p3 = scmp.ge.s32.totalorder %s1402_s21, 1 }
   0x9   : > { %s1522_s25 = scalar_select %p269_p0, %s1398_s20, %s271_s24  }
   0xa   : > { %p1524_p4 = por %p282_p2, %p281_p1  ;;  %p367_p5 = scmp.lt.s32.totalorder %s1402_s21, 4 }
   0xc   : > { %p368_p6 = pnand %p1099_p3, %p367_p5 }
   0xd   : > { %v458_v1 = vld [vmem:[%s1664_s3] sm:$0xff] (!%p368_p6)  ;;  %v459_v2 = vld [vmem:[%s1664_s3 + $0x8] sm:$0xff] (!%p368_p6)  ;;  %s1538_s14 = sshll.u32 (!%p368_p6), %s1512_s10, 1  ;;  %v638_v10 = vld [vmem:[%s1666_s5 + $0x10] sm:$0xff] (!%p368_p6)  ;;  %vm460_vm0 = vcmask (!%p368_p6), 130048   ;;  %vm651_vm1 = vcmask (!%p368_p6), 523264  }
   0xe   : > { %371 = sbr.rel (%p368_p6) target bundleno = 890 (0x37a), region = 64  ;;  %v454_v3 = vld [vmem:[%s1663_s2] sm:$0xff] (!%p368_p6)  ;;  %v1218_v4 = vpack.c.bf16 (!%p368_p6), %v459_v2, %v458_v1  ;;  %v455_v5 = vld [vmem:[%s1663_s2 + $0x8] sm:$0xff] (!%p368_p6)  ;;  %p424_p7 = scmp.lt.s32.totalorder (!%p368_p6), %s1538_s14, 4  ;;  %v639_v11 = vld [vmem:[%s1666_s5 + $0x18] sm:$0xff] (!%p368_p6)  ;;  %vm846_vm2 = vcmask (!%p368_p6), 261120  }
   0xf   : > { %v636_v6 = vld [vmem:[%s1666_s5] sm:$0xff] (!%p368_p6)  ;;  %v637_v7 = vld [vmem:[%s1666_s5 + $0x8] sm:$0xff] (!%p368_p6)  ;;  %v1222_v8 = vpack.c.bf16 (!%p368_p6), %v455_v5, %v454_v3  ;;  %v1230_v15 = vpack.c.bf16 (!%p368_p6), %v639_v11, %v638_v10  ;;  %v642_v20 = vld [vmem:[%s1666_s5 + $0x30] sm:$0xff] (!%p368_p6)  ;;  %vm862_vm3 = vcmask (!%p368_p6), 7168  }
  0x10   : > { %v1226_v9 = vpack.c.bf16 (!%p368_p6), %v637_v7, %v636_v6  ;;  %1219 = vmatprep.subr.bf16.mxu1 (!%p368_p6), %v1218_v4  ;;  %v640_v17 = vld [vmem:[%s1666_s5 + $0x20] sm:$0xff] (!%p368_p6)  ;;  %v641_v18 = vld [vmem:[%s1666_s5 + $0x28] sm:$0xff] (!%p368_p6)  ;;  %v643_v21 = vld [vmem:[%s1666_s5 + $0x38] sm:$0xff] (!%p368_p6) }
  0x11   : > { %1223 = vmatprep.subr.bf16.mxu0 (!%p368_p6), %v1222_v8  ;;  %1221 = vmatpush3.bf16.msra.mxu1 (!%p368_p6), %v1218_v4  ;;  %v1234_v19 = vpack.c.bf16 (!%p368_p6), %v641_v18, %v640_v17  ;;  %v1238_v22 = vpack.c.bf16 (!%p368_p6), %v643_v21, %v642_v20  ;;  %v737_v23 = vld [vmem:[%s1668_s7] sm:$0xff] (!%p368_p6)  ;;  %v738_v24 = vld [vmem:[%s1668_s7 + $0x8] sm:$0xff] (!%p368_p6)  ;;  %v739_v25 = vld [vmem:[%s1668_s7 + $0x10] sm:$0xff] (!%p368_p6) }
  0x12   : > { %1225 = vmatpush3.bf16.msra.mxu0 (!%p368_p6), %v1222_v8  ;;  %1227 = vmatprep.subr.bf16.mxu1 (!%p368_p6), %v1226_v9  ;;  %v1242_v26 = vpack.c.bf16 (!%p368_p6), %v738_v24, %v737_v23  ;;  %v740_v27 = vld [vmem:[%s1668_s7 + $0x18] sm:$0xff] (!%p368_p6)  ;;  %v1109_v31 = vld [vmem:[%s1665_s4] ss:$0 sm:$0xff] (!%p368_p6)  ;;  %v742_v43 = vld [vmem:[%s1668_s7 + $0x28] sm:$0xff] (!%p368_p6) }
  0x13   : > { %v1246_v28 = vpack.c.bf16 (!%p368_p6), %v740_v27, %v739_v25  ;;  %v741_v42 = vld [vmem:[%s1668_s7 + $0x20] sm:$0xff] (!%p368_p6)  ;;  %v743_v45 = vld [vmem:[%s1668_s7 + $0x30] sm:$0xff] (!%p368_p6)  ;;  %v744_v46 = vld [vmem:[%s1668_s7 + $0x38] sm:$0xff] (!%p368_p6) }
  0x14   : > { %1243 = vmatprep.subr.bf16.mxu0 (!%p368_p6), %v1242_v26  ;;  %v1250_v44 = vpack.c.bf16 (!%p368_p6), %v742_v43, %v741_v42  ;;  %v1254_v47 = vpack.c.bf16 (!%p368_p6), %v744_v46, %v743_v45  ;;  %v1110_v48 = vld [vmem:[%s1667_s6] ss:$0 sm:$0xff] (!%p368_p6) }
  0x15   : > { %s425_s24 = scalar_select %p424_p7, %s1538_s14, 4  ;;  %v1113_v57 = vld [vmem:[%s1669_s8] ss:$0 sm:$0xff] }
  0x16   : > { %v1116_v0 = vld [vmem:[%s1670_s9] ss:$0 sm:$0xff] }
  0x17   : > { %s1102_s12 = sshll.u32 %s425_s24, 3  ;;  %v1117_v7 = vld [vmem:[#allocation2] ss:$0 sm:$0xff] }
  0x18   : > { %s441_s16 = scalar_lea.vmem %s1662_s1, %s1102_s12  ;;  %s427_s21 = scalar_lea.vmem %s1661_s0, %s1102_s12 }
  0x19   : > { %v456_v12 = vld [vmem:[%s441_s16] sm:$0xff]  ;;  %v457_v13 = vld [vmem:[%s441_s16 + $0x8] sm:$0xff]  ;;  %s416_s12 = sand.u32 1, %s1394_s19   ;;  %s873_s16 = ssub.s32 (%p1524_p4), 5, %s1538_s14 }
  0x1a   : > { %v452_v14 = vld [vmem:[%s427_s21] sm:$0xff]  ;;  %1170 = vmatprep.mubr.msk.f32.mxu1 %vm460_vm0, %v456_v12  ;;  %v453_v16 = vld [vmem:[%s427_s21 + $0x8] sm:$0xff]  ;;  %s1100_s13 = sshll.u32 %s416_s12, 4  ;;  %s1135_s19 = sshll.u32 (%p1524_p4), %s1512_s10, 4 }
  0x1b   : > { %1177 = vmatprep.mubr.msk.f32.mxu0 %vm460_vm0, %v452_v14  ;;  %1171 = vmatmul.mubr.msk.f32.vlgmr.msra.gmra.mrb[0].mxu1 %vm460_vm0, %v457_v13  ;;  %s1616_s15 = scalar_lea.vmem [#allocation3], %s1100_s13   ;;  %p874_p8 = scmp.lt.s32.totalorder (%p1524_p4), %s873_s16, 2 }
  0x1c   : > { %1178 = vmatmul.mubr.msk.f32.vlgmr.msra.gmra.mrb[0].mxu0 %vm460_vm0, %v453_v16  ;;  %1229 = vmatpush3.bf16.msra.mxu1 %v1226_v9  ;;  %s1627_s21 = scalar_lea.vmem (%p1524_p4), %s1672_s11, %s1135_s19  }
  0x1d   : > { %1231 = vmatprep.subr.bf16.mxu1 %v1230_v15  ;;  %1245 = vmatpush3.bf16.msra.mxu0 %v1242_v26 }
  0x1e   : > { %1247 = vmatprep.subr.bf16.mxu0 %v1246_v28 }
  0x20   : > { %1233 = vmatpush3.bf16.msra.mxu1 %v1230_v15 }
  0x21   : > { %1235 = vmatprep.subr.bf16.mxu1 %v1234_v19  ;;  %1249 = vmatpush3.bf16.msra.mxu0 %v1246_v28 }
  0x22   : > { %1251 = vmatprep.subr.bf16.mxu0 %v1250_v44 }
  0x24   : > { %1237 = vmatpush3.bf16.msra.mxu1 %v1234_v19 }
  0x25   : > { %1239 = vmatprep.subr.bf16.mxu1 %v1238_v22  ;;  %1253 = vmatpush3.bf16.msra.mxu0 %v1250_v44 }
  0x26   : > { %1255 = vmatprep.subr.bf16.mxu0 %v1254_v47 }
  0x28   : > { %1241 = vmatpush3.bf16.msra.mxu1 %v1238_v22 }
  0x29   : > { %1257 = vmatpush3.bf16.msra.mxu0 %v1254_v47 }
  0xee   : > { %v1172_v29 = vpop.f32.mrb[0].mxu1 }
  0xef   : > { %v1179_v30 = vpop.f32.mrb[0].mxu0  ;;  %v533_v33 = vpop.f32.mrb[1].mxu1 }
  0xf0   : > { %v620_v32 = vadd.f32 %v1179_v30, %v1172_v29  ;;  %v614_v34 = vpop.f32.mrb[1].mxu0 }
  0xf1   : > { %v615_v35 = vadd.f32 %v614_v34, %v533_v33 }
  0xf2   : > { %v631_v36 = vadd.f32 %v1109_v31, %v620_v32 }
  0xf3   : > { %v630_v37 = vadd.f32 %v1109_v31, %v615_v35 }
  0xf4   : > { %v633_v38 = vmul.f32 0.01, %v631_v36 }
  0xf5   : > { %v632_v39 = vmul.f32 0.01, %v630_v37 }
  0xf6   : > { %v635_v41 = vmax.f32 %v631_v36, %v633_v38 }
  0xf7   : > { %v634_v40 = vmax.f32 %v630_v37, %v632_v39 }
  0xf9   : > { %1196 = vmatprep.mubr.msk.f32.mxu1 %vm651_vm1, %v634_v40 }
  0xfa   : > { %1197 = vmatmul.mubr.msk.f32.vlgmr.msra.gmra.mrb[2].mxu1 %vm651_vm1, %v635_v41 }
 0x1cd   : > { %v1198_v49 = vpop.f32.mrb[2].mxu1 }
 0x1ce   : > { %v730_v50 = vadd.f32 %v1198_v49, %v1110_v48  ;;  %v724_v51 = vpop.f32.mrb[3].mxu1 }
 0x1cf   : > { %v725_v52 = vadd.f32 %v1110_v48, %v724_v51 }
 0x1d0   : > { %v734_v53 = vmul.f32 0.01, %v730_v50 }
 0x1d1   : > { %v733_v54 = vmul.f32 0.01, %v725_v52 }
 0x1d2   : > { %v736_v56 = vmax.f32 %v730_v50, %v734_v53 }
 0x1d3   : > { %v735_v55 = vmax.f32 %v725_v52, %v733_v54 }
 0x1d5   : > { %1215 = vmatprep.mubr.msk.f32.mxu0 %vm651_vm1, %v735_v55 }
 0x1d6   : > { %1216 = vmatmul.mubr.msk.f32.vlgmr.msra.gmra.mrb[2].mxu0 %vm651_vm1, %v736_v56 }
 0x2a9   : > { %v1217_v58 = vpop.f32.mrb[2].mxu0 }
 0x2aa   : > { %v830_v59 = vadd.f32 %v1217_v58, %v1113_v57  ;;  %v824_v60 = vpop.f32.mrb[3].mxu0 }
 0x2ab   : > { %v825_v61 = vadd.f32 %v1113_v57, %v824_v60 }
 0x2ac   : > { %v834_v62 = vmul.f32 0.01, %v830_v59 }
 0x2ad   : > { %v833_v63 = vmul.f32 0.01, %v825_v61 }
 0x2ae   : > { %v836_v1 = vmax.f32 %v830_v59, %v834_v62 }
 0x2af   : > { %v835_v2 = vmax.f32 %v825_v61, %v833_v63 }
 0x2b0   : > { %v845_v5 = vmul.f32 %v1116_v0, %v836_v1 }
 0x2b1   : > { %v844_v3 = vmul.f32 %v1116_v0, %v835_v2 }
 0x2b2   : > { %v850_v6 = vsel %vm846_vm2, %v845_v5, 0.0 }
 0x2b3   : > { %v847_v4 = vsel %vm846_vm2, %v844_v3, 0.0 }
 0x2b4   : > { %848 = vadd.xlane.f32.xlu0 %v847_v4 }
 0x2b8   : > { %851 = vadd.xlane.f32.xlu0 %v850_v6 }
 0x341   : > { %v849_v8 = vpop.xlane.xlu0 %848 }
 0x342   : > { %v860_v9 = vadd.f32 %v1117_v7, %v849_v8  ;;  %871 = sbr.rel (!%p1524_p4) target bundleno = 890 (0x37a), region = 68 }
 0x344   : > { %863 = vst.msk [vmem:[%s1616_s15] sm:$0xff] %vm862_vm3, %v860_v9 }
 0x345   : > { %v852_v10 = vpop.xlane.xlu0 %851 }
 0x346   : > { %v861_v11 = vadd.f32 %v1117_v7, %v852_v10 }
 0x348   : > { %864 = vst.msk [vmem:[%s1616_s15 + $0x8] sm:$0xff] %vm862_vm3, %v861_v11 }
 0x349   : > { %s1678_s16 = smov (!%p874_p8, %s873_s16), 2 }
 0x34a   : > { %s1120_s23 = sshll.u32 %s1678_s16, 7 }
 0x34b   : > { %p1123_p9 = scmp.eq.s32.totalorder %s1120_s23, 0 }
 0x34c   : > { %s1633_s24 = sshrl.u32 (!%p1123_p9), %s1678_s16, 1 }
 0x34d   : > { %882 = sbr.rel (%p1123_p9) target bundleno = 890 (0x37a), region = 72  ;;  %p1124_p10 = scmp.le.s32.totalorder (!%p1123_p9), %s1633_s24, 0 }
 0x354   : > { %1046 = sbr.rel (%p1124_p10) target bundleno = 869 (0x365), region = 151  ;;  %s1404_s10 = smov (!%p1124_p10), %s1627_s21  }
 0x355   : > { %s1408_s26 = smov (!%p1124_p10), %s1616_s15   ;;  %s1412_s14 = smov (!%p1124_p10), 0  }
 0x356   : > { %s1416_s27 = smov (!%p1124_p10), 0  }
 0x35b LB: >> { %v946_v12 = vld [vmem:[%s1410_s26] sm:$0xff]  ;;  %v948_v13 = vld [vmem:[%s1410_s26 + $0x8] sm:$0xff]  ;;  %s950_s28 = sadd.s32 1, %s1414_s14  ;;  %s940_s27 = sadd.s32 1, %s1418_s27   ;;  %s1418_s27 = sphi %s1416_s27, %s940_s27   ;;  %s1414_s14 = sphi %s1412_s14, %s1413_s14   ;;  %s1410_s26 = sphi %s1408_s26, %s955_s26   ;;  %s1406_s10 = sphi %s1404_s10, %s956_s10  }
 0x35c   : >> { %947 = vst [vmem:[%s1406_s10] sm:$0xff] %v946_v12  ;;  %949 = vst [vmem:[%s1406_s10 + $0x8] sm:$0xff] %v948_v13  ;;  %p951_p11 = scmp.ge.s32.totalorder %s950_s28, %s1633_s24  ;;  %p939_p12 = scmp.ge.s32.totalorder %s940_s27, %s1633_s24 }
 0x35e   : >> { %s1680_s28 = smov (%p951_p11, %s950_s28), 0  ;;  %942 = sbr.rel (!%p939_p12) target bundleno = 859 (0x35b), region = 157 }
 0x35f   : >> { %s1125_s29 = sshll.u32 %s1680_s28, 4  ;;  %s1413_s14 = smov %s1680_s28  }
 0x360   : >> { %s955_s26 = scalar_lea.vmem %s1616_s15, %s1125_s29 [#allocation3]   ;;  %s956_s10 = scalar_lea.vmem %s1627_s21, %s1125_s29  }
 0x365 PF: > { %s1643_s30 = sand.u32 1, %s1678_s16   ;;  %s1136_s12 = sshll.u32 %s1633_s24, 4 }
 0x366   : > { %s961_s13 = scalar_lea.vmem %s1616_s15, %s1136_s12 [#allocation3]   ;;  %s963_s19 = scalar_lea.vmem %s1627_s21, %s1136_s12  }
 0x367   : > { %p1130_p13 = scmp.le.s32.totalorder %s1643_s30, 0 }
 0x368   : > { %s1420_s17 = smov (!%p1130_p13), %s963_s19   ;;  %s1424_s18 = smov (!%p1130_p13), %s961_s13  }
 0x369   : > { %1060 = sbr.rel (%p1130_p13) target bundleno = 890 (0x37a), region = 162  ;;  %s1428_s23 = smov (!%p1130_p13), 0  }
 0x36a   : > { %s1432_s10 = smov (!%p1130_p13), 0  }
 0x370 LB: >> { %v973_v14 = vld [vmem:[%s1426_s18] sm:$0xff]  ;;  %s975_s16 = sadd.s32 1, %s1430_s23  ;;  %s967_s10 = sadd.s32 1, %s1434_s10   ;;  %s1434_s10 = sphi %s1432_s10, %s967_s10   ;;  %s1430_s23 = sphi %s1428_s23, %s1429_s23   ;;  %s1426_s18 = sphi %s1424_s18, %s980_s18   ;;  %s1422_s17 = sphi %s1420_s17, %s981_s17  }
 0x371   : >> { %974 = vst [vmem:[%s1422_s17] sm:$0xff] %v973_v14  ;;  %p976_p0 = scmp.ge.s32.totalorder %s975_s16, %s1643_s30  ;;  %p966_p1 = scmp.ge.s32.totalorder %s967_s10, %s1643_s30 }
 0x373   : >> { %s1682_s16 = smov (%p976_p0, %s975_s16), 0  ;;  %969 = sbr.rel (!%p966_p1) target bundleno = 880 (0x370), region = 168 }
 0x374   : >> { %s1131_s15 = sshll.u32 %s1682_s16, 3  ;;  %s1429_s23 = smov %s1682_s16  }
 0x375   : >> { %s980_s18 = scalar_lea.vmem %s961_s13, %s1131_s15 [#allocation3]   ;;  %s981_s17 = scalar_lea.vmem %s963_s19, %s1131_s15  }
 0x37a PF: > { %p20_p2 = scmp.ge.s32.totalorder %s1514_s22, 5   ;;  %s1674_s19 = smov %s1398_s20 }
 0x37b   : > { %s1675_s20 = smov %s1522_s25  ;;  %s1676_s21 = smov %s1514_s22 }
 0x37c   :  { %22 = sbr.rel (!%p20_p2) target bundleno = 5 (0x5), region = 179 }

</bundles_post_ra>
